<compile_context>
chip_gen: v5e
topology: v5e:2x2
jax: 0.10.0
libtpu: 0.0.40
codegen_flags: <defaults>
</compile_context>

<pallas_src>
import functools

import jax
import jax.numpy as jnp
from jax.experimental import pallas as pl
from jax.experimental.pallas import tpu as pltpu

BN_EPS = 1e-5      # PyTorch BatchNorm2d default eps
WSP_EPS = 1e-4     # the +0.0001 in WSPBlock
LANE = 128
SUBLANE = 8


def _round_up(x, m):
    return (x + m - 1) // m * m


def _wsp_kernel(x_ref, w_ref, b_ref, pooled_ref, *, batch, hw_valid):
    """One output-channel tile of WSPBlock (conv+BN folded, ReLU, weighted pool).

    x_ref:      (B*HW_pad, C)   backbone features (channels-last, flattened)
    w_ref:      (C, TN)         BN-folded 1x1 conv weight tile
    b_ref:      (1, TN)         BN-folded bias tile (f32)
    pooled_ref: (B, TN)         pooled output tile (f32, lane-dense)
    """
    tn = w_ref.shape[1]
    j = pl.program_id(0)
    col0 = pl.multiple_of(j * tn, tn)          # aligned lane offset into x's channels

    x2 = x_ref[...]                            # (M, C),  M = B*HW_pad
    m = x2.shape[0]
    hw_pad = m // batch

    # 1x1 conv (+ folded BN) as a single collapsed MXU matmul, then ReLU.
    xw = jnp.dot(x2, w_ref[...], preferred_element_type=jnp.float32)
    xw = jnp.maximum(xw + b_ref[...], 0.0)     # (M, TN) f32

    # Per-batch view for the spatial reductions (hw_pad % 8 == 0 -> aligned).
    xw3 = xw.reshape(batch, hw_pad, tn)

    # Mask zero-padded spatial rows: they would contribute ReLU(bias) to den.
    if hw_valid != hw_pad:                     # static Python check
        row = jax.lax.broadcasted_iota(jnp.int32, (1, hw_pad, 1), 1)
        xw3 = jnp.where(row < hw_valid, xw3, 0.0)

    # Matching channel columns of x for the weighted pooling (elementwise in f32).
    x_cols = x_ref[:, pl.ds(col0, tn)].astype(jnp.float32)
    x3 = x_cols.reshape(batch, hw_pad, tn)

    num = jnp.sum(x3 * xw3, axis=1)            # (B, TN)
    den = jnp.sum(xw3, axis=1) + WSP_EPS       # (B, TN)
    pooled_ref[...] = num / den


def iqanet_head_forward(feat_nchw, params, *, tn=512, weight_dtype=jnp.float32):
    """WSPBlock + fc head on a backbone feature map feat_nchw: (B, C, H, W)."""
    b, c, h, w = feat_nchw.shape
    hw = h * w
    # Pad spatial to a sublane multiple (for real v5e MXU fill one may pad
    # further so that B*hw_pad is a multiple of 128; masking handles any pad).
    hw_pad = _round_up(hw, SUBLANE)
    tn = min(tn, c)
    assert c % LANE == 0 and tn % LANE == 0 and c % tn == 0

    # Channels-last, flatten spatial, zero-pad, collapse batch for the matmul.
    x = jnp.transpose(feat_nchw, (0, 2, 3, 1)).reshape(b, hw, c)
    if hw_pad != hw:
        x = jnp.pad(x, ((0, 0), (0, hw_pad - hw), (0, 0)))
    x2d = x.reshape(b * hw_pad, c).astype(weight_dtype)

    # Fold eval-mode BatchNorm into the 1x1 conv (per-output-channel scale).
    scale = params["gamma"] * jax.lax.rsqrt(params["var"] + BN_EPS)       # (1, C)
    w_folded = (params["wconv"] * scale).astype(weight_dtype)             # (C, C)
    b_folded = ((params["bconv"] - params["mean"]) * scale
                + params["beta"]).astype(jnp.float32)                     # (1, C)

    grid = (c // tn,)
    kernel = functools.partial(_wsp_kernel, batch=b, hw_valid=hw)

    # Explicit VMEM budget: resident x + double-buffered weight/bias/out tiles.
    itemsize = jnp.dtype(weight_dtype).itemsize
    est = (b * hw_pad * c * itemsize           # x resident across the grid
           + 2 * c * tn * itemsize             # double-buffered weight tiles
           + 2 * tn * 4 + 2 * b * tn * 4)      # bias + pooled tiles
    vmem_limit = int(min(32 * 1024 * 1024, max(16 * 1024 * 1024, 2 * est)))

    pooled = pl.pallas_call(
        kernel,
        out_shape=jax.ShapeDtypeStruct((b, c), jnp.float32),
        grid=grid,
        in_specs=[
            pl.BlockSpec((b * hw_pad, c), lambda j: (0, 0)),   # x: fetched once, resident
            pl.BlockSpec((c, tn), lambda j: (0, j)),           # weight streams over tiles
            pl.BlockSpec((1, tn), lambda j: (0, j)),           # folded bias tile
        ],
        out_specs=pl.BlockSpec((b, tn), lambda j: (0, j)),     # lane-dense pooled output
        compiler_params=pltpu.CompilerParams(
            dimension_semantics=("parallel",),                 # v7x: split tiles across TCs
            vmem_limit_bytes=vmem_limit,
        ),
    )(x2d, w_folded, b_folded)

    # Tiny lane-sparse fc head (C -> 5): plain JAX outside the kernel.
    return pooled @ params["wfc"] + params["bfc"][0]


def reference_forward(feat_nchw, p):
    """Pure-JAX reference of WSPBlock (unfolded BN) + fc."""
    b, c, h, w = feat_nchw.shape
    x = jnp.transpose(feat_nchw, (0, 2, 3, 1)).reshape(b, h * w, c)
    xw = jnp.einsum("bpc,cd->bpd", x, p["wconv"]) + p["bconv"][0]
    xw = (xw - p["mean"][0]) * jax.lax.rsqrt(p["var"][0] + BN_EPS) * p["gamma"][0] + p["beta"][0]
    xw = jnp.maximum(xw, 0.0)
    num = jnp.sum(x * xw, axis=1)
    den = jnp.sum(xw, axis=1) + WSP_EPS
    pooled = num / den
    return pooled @ p["wfc"] + p["bfc"][0]


def make_params(key, c, ncls):
    ks = jax.random.split(key, 8)
    return {
        # WSPBlock 1x1 conv: PyTorch weight (C_out, C_in, 1, 1) stored as (C_in, C_out)
        "wconv": jax.random.normal(ks[0], (c, c), jnp.float32) * 0.05,
        "bconv": jax.random.normal(ks[1], (1, c), jnp.float32) * 0.05,
        # BatchNorm2d(C), eval mode: affine params + running stats
        "gamma": 1.0 + 0.1 * jax.random.normal(ks[2], (1, c), jnp.float32),
        "beta": 0.1 * jax.random.normal(ks[3], (1, c), jnp.float32),
        "mean": 0.1 * jax.random.normal(ks[4], (1, c), jnp.float32),
        "var": 0.5 + jnp.abs(jax.random.normal(ks[5], (1, c), jnp.float32)),
        # fc: Linear(C, 5): PyTorch weight (5, C) stored transposed as (C, 5)
        "wfc": jax.random.normal(ks[6], (c, ncls), jnp.float32) * 0.05,
        "bfc": jax.random.normal(ks[7], (1, ncls), jnp.float32) * 0.05,
    }


if __name__ == "__main__":
    # Small stand-in shapes (real model: C=2048, h=w=7, classes=5).
    B, C, H, W, NCLS = 2, 256, 7, 7, 5

    key = jax.random.PRNGKey(0)
    kx, kp = jax.random.split(key)
    # Deterministic stand-in for the frozen ResNet101 trunk's feature map
    # (post-ReLU -> nonnegative), NCHW like the PyTorch module would produce.
    feat = jnp.maximum(jax.random.normal(kx, (B, C, H, W), jnp.float32), 0.0)
    params = make_params(kp, C, NCLS)

    ref = reference_forward(feat, params)

    # f32 path (tn=128 -> 2-tile grid at C=256, exercising the weight streaming).
    out = jax.block_until_ready(iqanet_head_forward(feat, params, tn=128))
    assert out.shape == (B, NCLS), out.shape
    assert jnp.allclose(out, ref, atol=2e-3, rtol=2e-3), (out, ref)

    # bf16 weight/activation path (the v6e/v7x recommendation for real C=2048).
    out_bf16 = jax.block_until_ready(
        iqanet_head_forward(feat, params, tn=128, weight_dtype=jnp.bfloat16))
    assert out_bf16.shape == (B, NCLS), out_bf16.shape
    assert jnp.allclose(out_bf16, ref, atol=1e-1, rtol=1e-1), (out_bf16, ref)

    print("KERNEL_OK")
</pallas_src>

<mosaic_0001>
module attributes {stable_mosaic.version = 11 : i64} {
  func.func @_wsp_kernel(%arg0: i32, %arg1: memref<112x256xf32, #tpu.memory_space<vmem>>, %arg2: memref<256x128xf32, #tpu.memory_space<vmem>>, %arg3: memref<1x128xf32, #tpu.memory_space<vmem>>, %arg4: memref<2x128xf32, #tpu.memory_space<vmem>>) attributes {dimension_semantics = [#tpu.dimension_semantics<parallel>], iteration_bounds = array<i64: 2>, scalar_prefetch = 0 : i64, scratch_operands = 0 : i64, tpu.core_type = #tpu.core_type<tc>, window_params = [{pipeline_mode = #tpu.pipeline_mode<synchronous>, transform_indices = @transform_0, window_bounds = array<i64: 112, 256>}, {transform_indices = @transform_1, window_bounds = array<i64: 256, 128>}, {transform_indices = @transform_2, window_bounds = array<i64: 1, 128>}, {transform_indices = @transform_3, window_bounds = array<i64: 2, 128>}]} {
    %c128_i32 = arith.constant 128 : i32
    %0 = arith.muli %arg0, %c128_i32 : i32
    %1 = tpu.assume_multiple %0, 128 : i32
    %c0 = arith.constant 0 : index
    %c0_0 = arith.constant 0 : index
    %2 = vector.load %arg1[%c0, %c0_0] : memref<112x256xf32, #tpu.memory_space<vmem>>, vector<112x256xf32>
    %c0_1 = arith.constant 0 : index
    %c0_2 = arith.constant 0 : index
    %3 = vector.load %arg2[%c0_1, %c0_2] : memref<256x128xf32, #tpu.memory_space<vmem>>, vector<256x128xf32>
    %cst = arith.constant dense<0.000000e+00> : vector<112x128xf32>
    %4 = tpu.matmul %2, %3, %cst {dimension_numbers = #tpu.dot_dimension_numbers<[1], [0], [0], [1], [0, 0, 1, 1], [], []>} : vector<112x256xf32>, vector<256x128xf32>, vector<112x128xf32> -> vector<112x128xf32>
    %c0_3 = arith.constant 0 : index
    %c0_4 = arith.constant 0 : index
    %5 = vector.load %arg3[%c0_3, %c0_4] : memref<1x128xf32, #tpu.memory_space<vmem>>, vector<1x128xf32>
    %6 = vector.broadcast %5 : vector<1x128xf32> to vector<112x128xf32>
    %7 = arith.addf %4, %6 : vector<112x128xf32>
    %cst_5 = arith.constant 0.000000e+00 : f32
    %8 = vector.broadcast %cst_5 : f32 to vector<112x128xf32>
    %9 = arith.maximumf %7, %8 : vector<112x128xf32>
    %10 = vector.shape_cast %9 : vector<112x128xf32> to vector<2x56x128xf32>
    %11 = tpu.iota {dimensions = array<i32: 1>} : vector<1x56x1xi32>
    %c49_i32 = arith.constant 49 : i32
    %12 = vector.broadcast %c49_i32 : i32 to vector<1x56x1xi32>
    %13 = arith.cmpi slt, %11, %12 : vector<1x56x1xi32>
    %cst_6 = arith.constant 0.000000e+00 : f32
    %14 = vector.shape_cast %13 : vector<1x56x1xi1> to vector<1x56x1xi1>
    %15 = vector.broadcast %14 : vector<1x56x1xi1> to vector<2x56x128xi1>
    %16 = vector.broadcast %cst_6 : f32 to vector<2x56x128xf32>
    %17 = arith.select %15, %10, %16 : vector<2x56x128xi1>, vector<2x56x128xf32>
    %c0_7 = arith.constant 0 : index
    %18 = arith.index_cast %1 : i32 to index
    %19 = vector.load %arg1[%c0_7, %18] : memref<112x256xf32, #tpu.memory_space<vmem>>, vector<112x128xf32>
    %20 = vector.shape_cast %19 : vector<112x128xf32> to vector<2x56x128xf32>
    %21 = arith.mulf %20, %17 : vector<2x56x128xf32>
    %cst_8 = arith.constant dense<0.000000e+00> : vector<2x128xf32>
    %22 = vector.multi_reduction <add>, %21, %cst_8 [1] : vector<2x56x128xf32> to vector<2x128xf32>
    %cst_9 = arith.constant dense<0.000000e+00> : vector<2x128xf32>
    %23 = vector.multi_reduction <add>, %17, %cst_9 [1] : vector<2x56x128xf32> to vector<2x128xf32>
    %cst_10 = arith.constant 9.99999974E-5 : f32
    %24 = vector.broadcast %cst_10 : f32 to vector<2x128xf32>
    %25 = arith.addf %23, %24 : vector<2x128xf32>
    %26 = arith.divf %22, %25 : vector<2x128xf32>
    %c0_11 = arith.constant 0 : index
    %c0_12 = arith.constant 0 : index
    %27 = vector.load %arg4[%c0_11, %c0_12] : memref<2x128xf32, #tpu.memory_space<vmem>>, vector<2x128xf32>
    tpu.vector_store %arg4[%c0_11, %c0_12], %26 {strides = array<i32>} : memref<2x128xf32, #tpu.memory_space<vmem>>, vector<2x128xf32>,
    return
  }
  func.func @transform_0(%arg0: i32) -> (i32, i32) {
    %c0_i32 = arith.constant 0 : i32
    %c0_i32_0 = arith.constant 0 : i32
    %c0_i32_1 = arith.constant 0 : i32
    return %c0_i32, %c0_i32_0 : i32, i32
  }
  func.func @transform_1(%arg0: i32) -> (i32, i32) {
    %c0_i32 = arith.constant 0 : i32
    %c0_i32_0 = arith.constant 0 : i32
    return %c0_i32, %arg0 : i32, i32
  }
  func.func @transform_2(%arg0: i32) -> (i32, i32) {
    %c0_i32 = arith.constant 0 : i32
    %c0_i32_0 = arith.constant 0 : i32
    return %c0_i32, %arg0 : i32, i32
  }
  func.func @transform_3(%arg0: i32) -> (i32, i32) {
    %c0_i32 = arith.constant 0 : i32
    %c0_i32_0 = arith.constant 0 : i32
    return %c0_i32, %arg0 : i32, i32
  }
}

</mosaic_0001>

<bundles_post_ra>
// kernel: tpu_custom_call.1
= control target key start
LH: loop header
LB: loop body
LE: loop exit
PB: predicated region body
PF: predicated region fallthrough
CT: control target
= control target key end

     0   :  { %8 = vsyncpa [#allocation3], 0  ;;  %s1278_s0 = inlined_call_operand.hbm [shape: f32[112,256], index: 0, kind: input, shape index: {}]   ;;  %s1279_s1 = inlined_call_operand.hbm [shape: f32[256,256], index: 1, kind: input, shape index: {}]   ;;  %s1280_s2 = inlined_call_operand.hbm [shape: f32[1,256], index: 2, kind: input, shape index: {}]   ;;  %s1281_s3 = inlined_call_operand.hbm [shape: f32[2,256], index: 3, kind: output, shape index: {}]  }
   0x1   :  { %9 = vsyncpa [#allocation6], 0 }
   0x2   :  { %11 = vsyncpa [#allocation6 + $0x1], 0 }
   0x3   :  { %12 = vsyncpa [#allocation4], 0 }
   0x4   :  { %14 = vsyncpa [#allocation4 + $0x1], 0  ;;  %s1019_s12 = smov 0   ;;  %s1021_s13 = smov 0  }
   0x5   :  { %s1023_s14 = smov 0   ;;  %s1025_s15 = smov 0  }
   0x6 LB: > { %s1040_s16 = sadd.s32 1, %s992_s15   ;;  %s48_s17 = sadd.s32 1, %s988_s14  ;;  %s992_s15 = sphi %s1025_s15, %s1291_s15   ;;  %s988_s14 = sphi %s1023_s14, %s1290_s14   ;;  %s984_s13 = sphi %s1021_s13, %s1289_s13   ;;  %s980_s12 = sphi %s1019_s12, %s1288_s12  }
   0x7   : > { %s45_s18 = ssub.s32 %s992_s15, %s1040_s16  ;;  %p55_p0 = scmp.ne.s32.totalorder %s988_s14, %s984_s13 }
   0x8   : > { %p46_p1 = scmp.eq.s32.totalorder %s45_s18, 0  ;;  %p56_p2 = scmp.eq.s32.totalorder %s992_s15, 0 }
   0x9   : > { %p787_p5 = scmp.lt.s32.totalorder %s992_s15, 2  ;;  %s151_s20 = sand.u32 1, %s992_s15  }
   0xa   : > { %s1050_s19 = scalar_select %p46_p1, %s988_s14, %s48_s17  }
   0xb   : > { %p57_p4 = por %p56_p2, %p55_p0  ;;  %s153_s21 = sand.u32 1, %s988_s14  }
   0xc   : > { %s717_s22 = sshll.u32 %s153_s21, 8  ;;  %s718_s23 = sshll.u32 %s992_s15, 3 }
   0xd   : > { %s159_s26 = scalar_lea.hbm %s1279_s1, %s718_s23  ;;  %s155_s27 = scalar_lea.vmem [#allocation5], %s717_s22 }
   0xe   : > { %s162_s28 = sshll.u32 %s155_s27, 4  ;;  %s160_s29 = sshll.u32 %s159_s26, 4  ;;  %s163_s28 = int_to_ptr.vmem [resolvable:$true] %s162_s28  ;;  %s161_s29 = int_to_ptr.hbm [resolvable:$true] %s160_s29 }
   0xf   : > { %p1064_p6 = pnand %p787_p5, %p57_p4  ;;  %s1068_s4 = scalar_lea.sflag [#allocation6], %s151_s20 }
  0x10   : > { %s832_s5 = sshra.s32 %s161_s29, 4  ;;  %s839_s9 = scalar_lea.hbm %s1279_s1, 512  ;;  %s833_s5 = int_to_ptr.hbm [resolvable:$true] %s832_s5 }
  0x11   : > { %s834_s6 = scalar_lea.hbm %s833_s5, 256  ;;  %p836_p8 = pneg %p1064_p6 }
  0x12   : > { %p835_p7 = scmp.ne.s32.totalorder %s833_s5, %s834_s6  ;;  %p840_p11 = scmp.lt.s32.totalorder %s833_s5, %s1279_s1 }
  0x13   : > { %p841_p12 = scmp.lt.s32.totalorder %s839_s9, %s834_s6 }
  0x14   : > { %p837_p9 = pnand %p836_p8, %p835_p7 }
  0x15   : > { %p842_p13 = por %p841_p12, %p840_p11 }
  0x16   : > { %p838_p10 = pneg %p837_p9 }
  0x18   : > { %p843_p1 = pnand %p842_p13, %p838_p10 }
  0x1a   : > { %846 = shalt.err (!%p843_p1)
}
  0x1b   : > { %s994_s17 = smov 256   ;;  %s995_s18 = smov 128  }
  0x1c   : > { %s996_s20 = smov 8   ;;  %s1086_s22 = sadd.s32 4294967295, %s992_s15  }
  0x1d   : > { %778 = dma.hbm_to_vmem [thread:$0]  (!%p1064_p6), %s161_s29, 4096, %s163_s28, %s1068_s4, %s994_s17, %s995_s18, %s996_s20  }
  0x1e   : > { %s713_s23 = sadd.s32 4294967294, %s992_s15   ;;  %p61_p2 = scmp.ne.s32.totalorder %s984_s13, %s980_s12 }
  0x1f   : > { %p62_p4 = scmp.eq.s32.totalorder %s1086_s22, 0  ;;  %p111_p5 = scmp.eq.s32.totalorder %s1086_s22, 1 }
  0x20   : > { %p117_p7 = scmp.eq.s32.totalorder %s713_s23, 1  ;;  %p714_p9 = scmp.ge.s32.totalorder %s992_s15, 1 }
  0x21   : > { %p1096_p10 = por %p62_p4, %p61_p2  ;;  %p1103_p11 = por %p111_p5, %p55_p0 }
  0x22   : > { %p1107_p12 = por %p117_p7, %p61_p2  ;;  %p124_p13 = scmp.lt.s32.totalorder %s992_s15, 3 }
  0x23   : > { %s135_s29 = sshll.u32 %s1278_s0, 4  ;;  %s997_s6 = smov [#allocation2]   ;;  %s136_s29 = int_to_ptr.hbm [resolvable:$true] %s135_s29 }
  0x24   : > { %p1115_p1 = pnand %p714_p9, %p124_p13  ;;  %s137_s7 = sshll.u32 %s997_s6, 4  ;;  %s138_s7 = int_to_ptr.vmem [resolvable:$true] %s137_s7 }
  0x25   : > { %s178_s10 = scalar_lea.hbm %s1280_s2, %s992_s15  ;;  %s175_s18 = scalar_lea.vmem [#allocation7], %s153_s21 }
  0x26   : > { %p771_p0 = pneg %p1115_p1  ;;  %s180_s11 = sshll.u32 %s178_s10, 4  ;;  %s181_s11 = int_to_ptr.hbm [resolvable:$true] %s180_s11 }
  0x27   : > { %s182_s20 = sshll.u32 %s175_s18, 4  ;;  %s998_s23 = smov 16   ;;  %s183_s20 = int_to_ptr.vmem [resolvable:$true] %s182_s20 }
  0x28   : > { %p772_p2 = pnand %p771_p0, %p62_p4  ;;  %s892_s27 = sshra.s32 %s181_s11, 4  ;;  %s893_s27 = int_to_ptr.hbm [resolvable:$true] %s892_s27 }
  0x29   : > { %s894_s28 = scalar_lea.hbm %s893_s27, 1  ;;  %s899_s9 = scalar_lea.hbm %s1280_s2, 2 }
  0x2a   : > { %774 = dma.hbm_to_vmem [thread:$0]  (!%p772_p2), %s136_s29, 3584, %s138_s7, [#allocation3], %s994_s17, %s994_s17, %s998_s23  }
  0x2b   : > { %p895_p5 = scmp.ne.s32.totalorder %s893_s27, %s894_s28  ;;  %p900_p13 = scmp.lt.s32.totalorder %s893_s27, %s1280_s2 }
  0x2c   : > { %p901_p0 = scmp.lt.s32.totalorder %s899_s9, %s894_s28 }
  0x2d   : > { %p897_p7 = pnand %p895_p5, %p836_p8 }
  0x2e   : > { %p902_p3 = por %p901_p0, %p900_p13 }
  0x2f   : > { %p898_p9 = pneg %p897_p7 }
  0x31   : > { %p903_p2 = pnand %p902_p3, %p898_p9 }
  0x33   : > { %906 = shalt.err (!%p903_p2)
}
  0x34   : > { %781 = dma.hbm_to_vmem [thread:$0]  (!%p1064_p6), %s181_s11, 16, %s183_s20, %s1068_s4  }
  0x35   : > { %191 = sbr.rel (%p1115_p1) target bundleno = 321 (0x141), region = 32 }
  0x3a   : > { %967 = dma.done.wait (%p62_p4), [#allocation3], 3584  }
  0x3b   : > { %969 = vsyncadd (%p62_p4), [#allocation3], 4294963712  ;;  %s198_s17 = sand.u32 1, %s1086_s22   ;;  %s1151_s29 = sand.u32 1, %s984_s13  }
  0x3c   : > { %s721_s7 = sshll.u32 %s1151_s29, 8  ;;  %s199_s30 = scalar_lea.sflag [#allocation6], %s198_s17 }
  0x3d   : > { %s1154_s18 = scalar_lea.vmem [#allocation5], %s721_s7 }
  0x3e   : > { %971 = dma.done.wait (%p1096_p10), %s199_s30, 4112  }
  0x3f   : > { %973 = vsyncadd (%p1096_p10), %s199_s30, 4294963184  ;;  %v283_v0 = vld [vmem:[%s1154_s18 + $0x78] sm:$0xff]  ;;  %v282_v1 = vld [vmem:[%s1154_s18 + $0x70] sm:$0xff]  ;;  %s211_s4 = scalar_lea.vmem [#allocation7], %s1151_s29  ;;  %s723_s24 = sshll.u32 %s1086_s22, 7  ;;  %vm593_vm9 = vcmask 1041409  }
  0x40   : > { %v299_v2 = vld [vmem:[%s1154_s18 + $0xf8] sm:$0xff]  ;;  %304 = vmatpush.msra.mxu0 %v283_v0  ;;  %729 = vmatpush.msra.mxu2 %v283_v0  ;;  %v298_v3 = vld [vmem:[%s1154_s18 + $0xf0] sm:$0xff]  ;;  %v281_v4 = vld [vmem:[%s1154_s18 + $0x68] sm:$0xff]  ;;  %s479_s5 = sshra.s32 %s723_s24, 7  ;;  %s722_s23 = sshll.u32 %s1151_s29, 1 }
  0x41   : > { %363 = vmatpush.msra.mxu1 %v299_v2  ;;  %745 = vmatpush.msra.mxu3 %v299_v2  ;;  %v297_v5 = vld [vmem:[%s1154_s18 + $0xe8] sm:$0xff]  ;;  %v280_v6 = vld [vmem:[%s1154_s18 + $0x60] sm:$0xff]  ;;  %v279_v8 = vld [vmem:[%s1154_s18 + $0x58] sm:$0xff]  ;;  %s724_s11 = sshll.u32 %s479_s5, 3  ;;  %s726_s27 = sshll.u32 %s1086_s22, 1 }
  0x42   : > { %305 = vmatpush.msra.mxu0 %v282_v1  ;;  %730 = vmatpush.msra.mxu2 %v282_v1  ;;  %v296_v7 = vld [vmem:[%s1154_s18 + $0xe0] sm:$0xff]  ;;  %v295_v9 = vld [vmem:[%s1154_s18 + $0xd8] sm:$0xff]  ;;  %v278_v10 = vld [vmem:[%s1154_s18 + $0x50] sm:$0xff]  ;;  %s1218_s20 = scalar_lea.vmem [#allocation2], %s724_s11  ;;  %s608_s8 = scalar_lea.hbm %s1281_s3, %s726_s27 }
  0x43   : > { %364 = vmatpush.msra.mxu1 %v298_v3  ;;  %746 = vmatpush.msra.mxu3 %v298_v3  ;;  %v294_v11 = vld [vmem:[%s1154_s18 + $0xd0] sm:$0xff]  ;;  %v277_v12 = vld [vmem:[%s1154_s18 + $0x48] sm:$0xff]  ;;  %v276_v14 = vld [vmem:[%s1154_s18 + $0x40] sm:$0xff]  ;;  %s238_s22 = scalar_lea.vmem [#allocation8], %s722_s23  ;;  %s612_s21 = sshll.u32 %s608_s8, 4  ;;  %s613_s21 = int_to_ptr.hbm [resolvable:$true] %s612_s21 }
  0x44   : > { %306 = vmatpush.msra.mxu0 %v281_v4  ;;  %731 = vmatpush.msra.mxu2 %v281_v4  ;;  %v293_v13 = vld [vmem:[%s1154_s18 + $0xc8] sm:$0xff]  ;;  %v292_v15 = vld [vmem:[%s1154_s18 + $0xc0] sm:$0xff]  ;;  %v275_v16 = vld [vmem:[%s1154_s18 + $0x38] sm:$0xff]  ;;  %s610_s9 = sshll.u32 %s238_s22, 4  ;;  %s598_s10 = scalar_lea.sflag [#allocation4], %s1151_s29  ;;  %s611_s9 = int_to_ptr.vmem [resolvable:$true] %s610_s9 }
  0x45   : > { %365 = vmatpush.msra.mxu1 %v297_v5  ;;  %747 = vmatpush.msra.mxu3 %v297_v5  ;;  %v291_v17 = vld [vmem:[%s1154_s18 + $0xb8] sm:$0xff]  ;;  %v274_v18 = vld [vmem:[%s1154_s18 + $0x30] sm:$0xff]  ;;  %v273_v20 = vld [vmem:[%s1154_s18 + $0x28] sm:$0xff]  ;;  %s936_s17 = sshra.s32 %s613_s21, 4  ;;  %s937_s17 = int_to_ptr.hbm [resolvable:$true] %s936_s17 }
  0x46   : > { %307 = vmatpush.msra.mxu0 %v280_v6  ;;  %732 = vmatpush.msra.mxu2 %v280_v6  ;;  %v290_v19 = vld [vmem:[%s1154_s18 + $0xb0] sm:$0xff]  ;;  %v289_v21 = vld [vmem:[%s1154_s18 + $0xa8] sm:$0xff]  ;;  %v272_v22 = vld [vmem:[%s1154_s18 + $0x20] sm:$0xff]  ;;  %s938_s7 = scalar_lea.hbm %s937_s17, 2  ;;  %p943_p4 = scmp.lt.s32.totalorder %s937_s17, %s1281_s3 }
  0x47   : > { %366 = vmatpush.msra.mxu1 %v296_v7  ;;  %748 = vmatpush.msra.mxu3 %v296_v7  ;;  %v288_v23 = vld [vmem:[%s1154_s18 + $0xa0] sm:$0xff]  ;;  %v271_v24 = vld [vmem:[%s1154_s18 + $0x18] sm:$0xff]  ;;  %v270_v26 = vld [vmem:[%s1154_s18 + $0x10] sm:$0xff]  ;;  %p939_p3 = scmp.ne.s32.totalorder %s937_s17, %s938_s7 }
  0x48   : > { %308 = vmatpush.msra.mxu0 %v279_v8  ;;  %733 = vmatpush.msra.mxu2 %v279_v8  ;;  %v287_v25 = vld [vmem:[%s1154_s18 + $0x98] sm:$0xff]  ;;  %v286_v27 = vld [vmem:[%s1154_s18 + $0x90] sm:$0xff]  ;;  %v269_v28 = vld [vmem:[%s1154_s18 + $0x8] sm:$0xff] }
  0x49   : > { %367 = vmatpush.msra.mxu1 %v295_v9  ;;  %749 = vmatpush.msra.mxu3 %v295_v9  ;;  %v285_v29 = vld [vmem:[%s1154_s18 + $0x88] sm:$0xff]  ;;  %v268_v30 = vld [vmem:[%s1154_s18] sm:$0xff]  ;;  %v254_v32 = vld [vmem:[#allocation2 + $0x70] sm:$0xff]  ;;  %p940_p6 = pnand %p939_p3, %p1103_p11 }
  0x4a   : > { %309 = vmatpush.msra.mxu0 %v278_v10  ;;  %734 = vmatpush.msra.mxu2 %v278_v10  ;;  %v240_v31 = vld [vmem:[#allocation2] sm:$0xff]  ;;  %v241_v34 = vld [vmem:[#allocation2 + $0x8] sm:$0xff]  ;;  %v255_v35 = vld [vmem:[#allocation2 + $0x78] sm:$0xff] }
  0x4b   : > { %368 = vmatpush.msra.mxu1 %v294_v11  ;;  %750 = vmatpush.msra.mxu3 %v294_v11  ;;  %v284_v33 = vld [vmem:[%s1154_s18 + $0x80] sm:$0xff]  ;;  %v242_v36 = vld [vmem:[#allocation2 + $0x10] sm:$0xff]  ;;  %v243_v38 = vld [vmem:[#allocation2 + $0x18] sm:$0xff]  ;;  %p941_p8 = pneg %p940_p6 }
  0x4c   : > { %310 = vmatpush.msra.mxu0 %v277_v12  ;;  %735 = vmatpush.msra.mxu2 %v277_v12  ;;  %v256_v37 = vld [vmem:[#allocation2 + $0x80] sm:$0xff]  ;;  %v257_v39 = vld [vmem:[#allocation2 + $0x88] sm:$0xff]  ;;  %v258_v41 = vld [vmem:[#allocation2 + $0x90] sm:$0xff] }
  0x4d   : > { %369 = vmatpush.msra.mxu1 %v293_v13  ;;  %751 = vmatpush.msra.mxu3 %v293_v13  ;;  %v244_v40 = vld [vmem:[#allocation2 + $0x20] sm:$0xff]  ;;  %v245_v42 = vld [vmem:[#allocation2 + $0x28] sm:$0xff]  ;;  %v259_v43 = vld [vmem:[#allocation2 + $0x98] sm:$0xff] }
  0x4e   : > { %311 = vmatpush.msra.mxu0 %v276_v14  ;;  %736 = vmatpush.msra.mxu2 %v276_v14  ;;  %v246_v44 = vld [vmem:[#allocation2 + $0x30] sm:$0xff]  ;;  %v260_v45 = vld [vmem:[#allocation2 + $0xa0] sm:$0xff]  ;;  %v247_v46 = vld [vmem:[#allocation2 + $0x38] sm:$0xff] }
  0x4f   : > { %370 = vmatpush.msra.mxu1 %v292_v15  ;;  %752 = vmatpush.msra.mxu3 %v292_v15  ;;  %v261_v47 = vld [vmem:[#allocation2 + $0xa8] sm:$0xff]  ;;  %v248_v48 = vld [vmem:[#allocation2 + $0x40] sm:$0xff]  ;;  %v262_v49 = vld [vmem:[#allocation2 + $0xb0] sm:$0xff] }
  0x50   : > { %312 = vmatpush.msra.mxu0 %v275_v16  ;;  %737 = vmatpush.msra.mxu2 %v275_v16  ;;  %v249_v50 = vld [vmem:[#allocation2 + $0x48] sm:$0xff]  ;;  %v263_v51 = vld [vmem:[#allocation2 + $0xb8] sm:$0xff]  ;;  %v250_v52 = vld [vmem:[#allocation2 + $0x50] sm:$0xff] }
  0x51   : > { %371 = vmatpush.msra.mxu1 %v291_v17  ;;  %753 = vmatpush.msra.mxu3 %v291_v17  ;;  %v264_v53 = vld [vmem:[#allocation2 + $0xc0] sm:$0xff]  ;;  %v251_v54 = vld [vmem:[#allocation2 + $0x58] sm:$0xff]  ;;  %v265_v55 = vld [vmem:[#allocation2 + $0xc8] sm:$0xff] }
  0x52   : > { %313 = vmatpush.msra.mxu0 %v274_v18  ;;  %738 = vmatpush.msra.mxu2 %v274_v18  ;;  %v252_v56 = vld [vmem:[#allocation2 + $0x60] sm:$0xff]  ;;  %v266_v57 = vld [vmem:[#allocation2 + $0xd0] sm:$0xff]  ;;  %v253_v58 = vld [vmem:[#allocation2 + $0x68] sm:$0xff] }
  0x53   : > { %372 = vmatpush.msra.mxu1 %v290_v19  ;;  %754 = vmatpush.msra.mxu3 %v290_v19  ;;  %v267_v59 = vld [vmem:[#allocation2 + $0xd8] sm:$0xff]  ;;  %v1195_v11 = vld [vmem:[%s211_s4] ss:$0 sm:$0xff]  ;;  %s942_s4 = scalar_lea.hbm %s1281_s3, 4 }
  0x54   : > { %314 = vmatpush.msra.mxu0 %v273_v20  ;;  %739 = vmatpush.msra.mxu2 %v273_v20  ;;  %p944_p10 = scmp.lt.s32.totalorder %s942_s4, %s938_s7 }
  0x55   : > { %373 = vmatpush.msra.mxu1 %v289_v21  ;;  %755 = vmatpush.msra.mxu3 %v289_v21 }
  0x56   : > { %315 = vmatpush.msra.mxu0 %v272_v22  ;;  %740 = vmatpush.msra.mxu2 %v272_v22  ;;  %p945_p1 = por %p944_p10, %p943_p4 }
  0x57   : > { %374 = vmatpush.msra.mxu1 %v288_v23  ;;  %756 = vmatpush.msra.mxu3 %v288_v23  ;;  %v436_v23 = vlaneseq }
  0x58   : > { %316 = vmatpush.msra.mxu0 %v271_v24  ;;  %741 = vmatpush.msra.mxu2 %v271_v24  ;;  %p946_p5 = pnand %p945_p1, %p941_p8 }
  0x59   : > { %375 = vmatpush.msra.mxu1 %v287_v25  ;;  %757 = vmatpush.msra.mxu3 %v287_v25 }
  0x5a   : > { %317 = vmatpush.msra.mxu0 %v270_v26  ;;  %742 = vmatpush.msra.mxu2 %v270_v26 }
  0x5b   : > { %376 = vmatpush.msra.mxu1 %v286_v27  ;;  %758 = vmatpush.msra.mxu3 %v286_v27 }
  0x5c   : > { %318 = vmatpush.msra.mxu0 %v269_v28  ;;  %743 = vmatpush.msra.mxu2 %v269_v28 }
  0x5d   : > { %377 = vmatpush.msra.mxu1 %v285_v29  ;;  %759 = vmatpush.msra.mxu3 %v285_v29 }
  0x5e   : > { %319 = vmatpush.msra.mxu0 %v268_v30  ;;  %744 = vmatpush.msra.mxu2 %v268_v30 }
  0x5f   : > { %320 = vmatmul.f32.vlgmr.msra.gmra.mxu0 %v240_v31  ;;  %341 = vmatmul.f32.vlgmr.msra.gmra.mxu2 %v254_v32 }
  0x60   : > { %378 = vmatpush.msra.mxu1 %v284_v33  ;;  %760 = vmatpush.msra.mxu3 %v284_v33 }
  0x61   : > { %379 = vmatmul.f32.vlgmr.msra.gmra.mxu1 %v241_v34  ;;  %400 = vmatmul.f32.vlgmr.msra.gmra.mxu3 %v255_v35 }
  0x67   : > { %323 = vmatmul.f32.gmra.mxu0 %v242_v36  ;;  %344 = vmatmul.f32.gmra.mxu2 %v256_v37  ;;  %v437_v36 = vshrl.u32 %v436_v23, 7 }
  0x69   : > { %382 = vmatmul.f32.gmra.mxu1 %v243_v38  ;;  %403 = vmatmul.f32.gmra.mxu3 %v257_v39 }
  0x6f   : > { %326 = vmatmul.f32.gmra.mxu0 %v244_v40  ;;  %347 = vmatmul.f32.gmra.mxu2 %v258_v41 }
  0x71   : > { %385 = vmatmul.f32.gmra.mxu1 %v245_v42  ;;  %406 = vmatmul.f32.gmra.mxu3 %v259_v43 }
  0x77   : > { %329 = vmatmul.f32.gmra.mxu0 %v246_v44  ;;  %350 = vmatmul.f32.gmra.mxu2 %v260_v45 }
  0x79   : > { %388 = vmatmul.f32.gmra.mxu1 %v247_v46  ;;  %409 = vmatmul.f32.gmra.mxu3 %v261_v47 }
  0x7f   : > { %332 = vmatmul.f32.gmra.mxu0 %v248_v48  ;;  %353 = vmatmul.f32.gmra.mxu2 %v262_v49  ;;  %v1216_v48 = vadd.s32 48, %v437_v36  ;;  %v484_v49 = vld [vmem:[%s1218_s20 + $0x10] sm:$0xff] }
  0x81   : > { %391 = vmatmul.f32.gmra.mxu1 %v249_v50  ;;  %412 = vmatmul.f32.gmra.mxu3 %v263_v51  ;;  %vm450_vm0 = vcmp.lt.s32.totalorder %v1216_v48, 49 }
  0x87   : > { %335 = vmatmul.f32.gmra.mxu0 %v250_v52  ;;  %356 = vmatmul.f32.gmra.mxu2 %v264_v53 }
  0x89   : > { %394 = vmatmul.f32.gmra.mxu1 %v251_v54  ;;  %415 = vmatmul.f32.gmra.mxu3 %v265_v55 }
  0x8f   : > { %338 = vmatmul.f32.gmra.mxu0 %v252_v56  ;;  %359 = vmatmul.f32.gmra.mxu2 %v266_v57 }
  0x91   : > { %397 = vmatmul.f32.gmra.mxu1 %v253_v58  ;;  %418 = vmatmul.f32.gmra.mxu3 %v267_v59  ;;  %v483_v58 = vld [vmem:[%s1218_s20] sm:$0xff] }
  0x92   : > { %v491_v59 = vld [vmem:[%s1218_s20 + $0x80] sm:$0xff] }
  0xdc   : > { %v321_v60 = vpop.f32.mrf.mxu0 }
  0xdd   : > { %v322_v16 = vadd.f32 %v1195_v11, %v321_v60 }
  0xde   : > { %v380_v61 = vpop.f32.mrf.mxu1 }
  0xdf   : > { %v381_v21 = vadd.f32 %v380_v61, %v322_v16  ;;  %v486_v16 = vld [vmem:[%s1218_s20 + $0x30] sm:$0xff] }
  0xe1   : > { %v422_v34 = vmax.f32 %v381_v21, 0.0 }
  0xe2   : > { %v342_v62 = vpop.f32.mrf.mxu2 }
  0xe3   : > { %v343_v28 = vadd.f32 %v1195_v11, %v342_v62 }
  0xe4   : > { %v324_v63 = vpop.f32.mrf.mxu0  ;;  %v401_v0 = vpop.f32.mrf.mxu3 }
  0xe5   : > { %v325_v14 = vadd.f32 %v1195_v11, %v324_v63  ;;  %v402_v40 = vadd.f32 %v401_v0, %v343_v28  ;;  %v494_v28 = vld [vmem:[%s1218_s20 + $0xb0] sm:$0xff] }
  0xe6   : > { %v383_v1 = vpop.f32.mrf.mxu1 }
  0xe7   : > { %v384_v18 = vadd.f32 %v383_v1, %v325_v14  ;;  %v429_v56 = vmax.f32 %v402_v40, 0.0 }
  0xe9   : > { %v423_v29 = vmax.f32 %v384_v18, 0.0 }
  0xea   : > { %v345_v2 = vpop.f32.mrf.mxu2 }
  0xeb   : > { %v346_v22 = vadd.f32 %v1195_v11, %v345_v2  ;;  %v535_v41 = vadd.f32 %v423_v29, %v422_v34  ;;  %v498_v1 = vmul.f32 %v484_v49, %v423_v29 }
  0xec   : > { %v327_v3 = vpop.f32.mrf.mxu0  ;;  %v404_v4 = vpop.f32.mrf.mxu3 }
  0xed   : > { %v328_v17 = vadd.f32 %v1195_v11, %v327_v3  ;;  %v405_v35 = vadd.f32 %v404_v4, %v346_v22  ;;  %v485_v3 = vld [vmem:[%s1218_s20 + $0x20] sm:$0xff] }
  0xee   : > { %v386_v5 = vpop.f32.mrf.mxu1 }
  0xef   : > { %v387_v24 = vadd.f32 %v386_v5, %v328_v17  ;;  %v430_v47 = vmax.f32 %v405_v35, 0.0  ;;  %v490_v5 = vld [vmem:[%s1218_s20 + $0x70] sm:$0xff]  ;;  %v493_v17 = vld [vmem:[%s1218_s20 + $0xa0] sm:$0xff] }
  0xf0   : > { %v504_v21 = vmul.f32 %v490_v5, %v429_v56 }
  0xf1   : > { %v424_v37 = vmax.f32 %v387_v24, 0.0  ;;  %v547_v2 = vadd.f32 %v430_v47, %v429_v56 }
  0xf2   : > { %v348_v6 = vpop.f32.mrf.mxu2 }
  0xf3   : > { %v349_v30 = vadd.f32 %v1195_v11, %v348_v6  ;;  %v536_v50 = vadd.f32 %v535_v41, %v424_v37  ;;  %v492_v6 = vld [vmem:[%s1218_s20 + $0x90] sm:$0xff]  ;;  %v499_v14 = vmul.f32 %v485_v3, %v424_v37 }
  0xf4   : > { %v330_v7 = vpop.f32.mrf.mxu0  ;;  %v407_v8 = vpop.f32.mrf.mxu3  ;;  %v488_v41 = vld [vmem:[%s1218_s20 + $0x50] sm:$0xff] }
  0xf5   : > { %v331_v19 = vadd.f32 %v1195_v11, %v330_v7  ;;  %v408_v42 = vadd.f32 %v407_v8, %v349_v30 }
  0xf6   : > { %v389_v9 = vpop.f32.mrf.mxu1 }
  0xf7   : > { %v1206_v31 = vadd.f32 %v389_v9, %v331_v19  ;;  %v431_v60 = vmax.f32 %v408_v42, 0.0  ;;  %v495_v42 = vld [vmem:[%s1218_s20 + $0xc0] sm:$0xff] }
  0xf9   : > { %v425_v43 = vmax.f32 %v1206_v31, 0.0  ;;  %v506_v22 = vmul.f32 %v492_v6, %v431_v60 }
  0xfa   : > { %v351_v10 = vpop.f32.mrf.mxu2 }
  0xfb   : > { %v352_v38 = vadd.f32 %v1195_v11, %v351_v10  ;;  %v537_v61 = vadd.f32 %v536_v50, %v425_v43  ;;  %v497_v10 = vmul.f32 %v483_v58, %v422_v34  ;;  %v489_v50 = vld [vmem:[%s1218_s20 + $0x60] sm:$0xff] }
  0xfc   : > { %v333_v12 = vpop.f32.mrf.mxu0  ;;  %v410_v13 = vpop.f32.mrf.mxu3 }
  0xfd   : > { %v334_v25 = vadd.f32 %v1195_v11, %v333_v12  ;;  %v411_v51 = vadd.f32 %v410_v13, %v352_v38  ;;  %v505_v12 = vmul.f32 %v491_v59, %v430_v47 }
  0xfe   : > { %v392_v15 = vpop.f32.mrf.mxu1 }
  0xff   : > { %v1210_v39 = vadd.f32 %v392_v15, %v334_v25  ;;  %v432_v7 = vmax.f32 %v411_v51, 0.0  ;;  %v548_v15 = vadd.f32 %v547_v2, %v431_v60  ;;  %v511_v25 = vadd.f32 %v498_v1, %v497_v10  ;;  %v496_v51 = vld [vmem:[%s1218_s20 + $0xd0] sm:$0xff] }
 0x101   : > { %v426_v52 = vmax.f32 %v1210_v39, 0.0  ;;  %v507_v34 = vmul.f32 %v493_v17, %v432_v7  ;;  %v512_v36 = vadd.f32 %v511_v25, %v499_v14 }
 0x102   : > { %v354_v20 = vpop.f32.mrf.mxu2 }
 0x103   : > { %v355_v44 = vadd.f32 %v1195_v11, %v354_v20  ;;  %v538_v8 = vadd.f32 %v537_v61, %v426_v52 }
 0x104   : > { %v336_v26 = vpop.f32.mrf.mxu0  ;;  %v413_v27 = vpop.f32.mrf.mxu3 }
 0x105   : > { %v337_v32 = vadd.f32 %v1195_v11, %v336_v26  ;;  %v414_v62 = vadd.f32 %v413_v27, %v355_v44  ;;  %v549_v26 = vadd.f32 %v548_v15, %v432_v7  ;;  %v487_v27 = vld [vmem:[%s1218_s20 + $0x40] sm:$0xff] }
 0x106   : > { %v395_v33 = vpop.f32.mrf.mxu1 }
 0x107   : > { %v1214_v45 = vadd.f32 %v395_v33, %v337_v32  ;;  %v433_v18 = vmax.f32 %v414_v62, 0.0  ;;  %v523_v32 = vadd.f32 %v505_v12, %v504_v21  ;;  %v500_v33 = vmul.f32 %v486_v16, %v425_v43 }
 0x109   : > { %v427_v63 = vmax.f32 %v1214_v45, 0.0  ;;  %v550_v37 = vadd.f32 %v549_v26, %v433_v18  ;;  %v524_v39 = vadd.f32 %v523_v32, %v506_v22  ;;  %v508_v40 = vmul.f32 %v494_v28, %v433_v18 }
 0x10a   : > { %v357_v46 = vpop.f32.mrf.mxu2  ;;  %v513_v47 = vadd.f32 %v512_v36, %v500_v33 }
 0x10b   : > { %v358_v53 = vadd.f32 %v1195_v11, %v357_v46  ;;  %v539_v19 = vadd.f32 %v538_v8, %v427_v63  ;;  %v525_v49 = vadd.f32 %v524_v39, %v507_v34 }
 0x10c   : > { %v339_v54 = vpop.f32.mrf.mxu0  ;;  %v416_v55 = vpop.f32.mrf.mxu3 }
 0x10d   : > { %v340_v57 = vadd.f32 %v1195_v11, %v339_v54  ;;  %v417_v9 = vadd.f32 %v416_v55, %v358_v53  ;;  %v502_v53 = vmul.f32 %v488_v41, %v427_v63  ;;  %v526_v58 = vadd.f32 %v525_v49, %v508_v40 }
 0x10e   : > { %v398_v0 = vpop.f32.mrf.mxu1 }
 0x10f   : > { %v399_v4 = vadd.f32 %v398_v0, %v340_v57  ;;  %v434_v29 = vmax.f32 %v417_v9, 0.0 }
 0x111   : > { %v428_v13 = vmax.f32 %v399_v4, 0.0  ;;  %v551_v45 = vadd.f32 %v550_v37, %v434_v29  ;;  %v509_v54 = vmul.f32 %v495_v42, %v434_v29 }
 0x112   : > { %v360_v20 = vpop.f32.mrf.mxu2 }
 0x113   : > { %v471_v23 = vsel %vm450_vm0, %v428_v13, 0.0  ;;  %v361_v24 = vadd.f32 %v1195_v11, %v360_v20  ;;  %v501_v11 = vmul.f32 %v487_v27, %v426_v52  ;;  %v527_v0 = vadd.f32 %v526_v58, %v509_v54 }
 0x114   : > { %v540_v30 = vadd.f32 %v539_v19, %v471_v23  ;;  %v419_v31 = vpop.f32.mrf.mxu3  ;;  %v503_v52 = vmul.f32 %v489_v50, %v471_v23 }
 0x115   : > { %v420_v35 = vadd.f32 %v419_v31, %v361_v24  ;;  %v514_v57 = vadd.f32 %v513_v47, %v501_v11 }
 0x116   : > { %v541_v38 = vrot.slane %v540_v30, 4 }
 0x117   : > { %v435_v44 = vmax.f32 %v420_v35, 0.0  ;;  %v515_v62 = vadd.f32 %v514_v57, %v502_v53 }
 0x118   : > { %v542_v46 = vadd.f32 %v541_v38, %v540_v30 }
 0x119   : > { %v478_v43 = vsel %vm450_vm0, %v435_v44, 0.0  ;;  %v516_v3 = vadd.f32 %v515_v62, %v503_v52 }
 0x11a   : > { %v543_v55 = vrot.slane %v542_v46, 2  ;;  %v552_v56 = vadd.f32 %v551_v45, %v478_v43  ;;  %v510_v60 = vmul.f32 %v496_v51, %v478_v43 }
 0x11b   : > { %v517_v63 = vrot.slane %v516_v3, 4 }
 0x11c   : > { %v544_v59 = vadd.f32 %v543_v55, %v542_v46  ;;  %v553_v61 = vrot.slane %v552_v56, 4  ;;  %v528_v5 = vadd.f32 %v527_v0, %v510_v60 }
 0x11d   : > { %v518_v12 = vadd.f32 %v517_v63, %v516_v3 }
 0x11e   : > { %v545_v1 = vrot.slane %v544_v59, 1  ;;  %v554_v2 = vadd.f32 %v553_v61, %v552_v56  ;;  %v529_v8 = vrot.slane %v528_v5, 4 }
 0x11f   : > { %v519_v17 = vrot.slane %v518_v12, 2 }
 0x120   : > { %v546_v4 = vadd.f32 %v545_v1, %v544_v59  ;;  %v555_v48 = vrot.slane %v554_v2, 2  ;;  %v530_v13 = vadd.f32 %v529_v8, %v528_v5 }
 0x121   : > { %v520_v22 = vadd.f32 %v519_v17, %v518_v12 }
 0x122   : > { %v559_v6 = vadd.f32 0.0001, %v546_v4  ;;  %v556_v7 = vadd.f32 %v555_v48, %v554_v2  ;;  %v531_v18 = vrot.slane %v530_v13, 2 }
 0x123   : > { %v521_v29 = vrot.slane %v520_v22, 1 }
 0x124   : > { %828 = vrcp.f32 %v559_v6  ;;  %v557_v9 = vrot.slane %v556_v7, 1  ;;  %v532_v23 = vadd.f32 %v531_v18, %v530_v13  ;;  %v572_v26 = vand.u32 2147483648, %v559_v6 }
 0x125   : > { %vm566_vm2 = vweird.f32 %v559_v6  ;;  %v570_v28 = vand.u32 2147483647, %v559_v6  ;;  %v522_v39 = vadd.f32 %v521_v29, %v520_v22 }
 0x126   : > { %v558_v10 = vadd.f32 %v557_v9, %v556_v7  ;;  %v533_v30 = vrot.slane %v532_v23, 1  ;;  %v573_v35 = vor.u32 1.1754944e-38, %v572_v26 }
 0x127   : > { %vm571_vm5 = vcmp.eq.f32.partialorder %v570_v28, 8.507059e+37 }
 0x128   : > { %v560_v14 = vadd.f32 0.0001, %v558_v10  ;;  %v534_v11 = vadd.f32 %v533_v30, %v532_v23 }
 0x12a   : > { %v829_v15 = vpop.eup %828  ;;  %830 = vrcp.f32 %v560_v14  ;;  %v587_v31 = vand.u32 2147483648, %v560_v14  ;;  %v585_v34 = vand.u32 2147483647, %v560_v14  ;;  %vm581_vm6 = vweird.f32 %v560_v14 }
 0x12b   : > { %v562_v16 = vmul.f32 %v829_v15, %v559_v6  ;;  %vm567_vm1 = vweird.f32 %v829_v15 }
 0x12c   : > { %vm568_vm3 = vmor %vm566_vm2, %vm567_vm1  ;;  %v588_v38 = vor.u32 1.1754944e-38, %v587_v31  ;;  %vm586_vm8 = vcmp.eq.f32.partialorder %v585_v34, 8.507059e+37 }
 0x12d   : > { %v563_v19 = vsub.f32 1.0, %v562_v16 }
 0x12f   : > { %v564_v20 = vmul.f32 %v829_v15, %v563_v19 }
 0x130   : > { %v831_v21 = vpop.eup %830 }
 0x131   : > { %v577_v24 = vmul.f32 %v831_v21, %v560_v14  ;;  %v565_v25 = vadd.f32 %v829_v15, %v564_v20  ;;  %vm582_vm4 = vweird.f32 %v831_v21 }
 0x132   : > { %vm583_vm7 = vmor %vm581_vm6, %vm582_vm4 }
 0x133   : > { %v578_v27 = vsub.f32 1.0, %v577_v24  ;;  %v569_v32 = vsel %vm568_vm3, %v829_v15, %v565_v25 }
 0x134   : > { %v574_v37 = vsel %vm571_vm5, %v573_v35, %v569_v32 }
 0x135   : > { %v579_v33 = vmul.f32 %v831_v21, %v578_v27  ;;  %v575_v42 = vmul.f32 %v574_v37, %v522_v39 }
 0x137   : > { %v580_v36 = vadd.f32 %v831_v21, %v579_v33 }
 0x139   : > { %v584_v40 = vsel %vm583_vm7, %v831_v21, %v580_v36 }
 0x13a   : > { %v589_v41 = vsel %vm586_vm8, %v588_v38, %v584_v40 }
 0x13b   : > { %v590_v44 = vmul.f32 %v589_v41, %v534_v11 }
 0x13d   : > { %v594_v45 = vsel %vm593_vm9, %v590_v44, %v575_v42 }
 0x13e   : > { %596 = vst [vmem:[%s238_s22] sm:$0x3] %v594_v45 }
 0x13f   : > { %949 = shalt.err (!%p946_p5)
}
 0x140   : > { %769 = dma.vmem_to_hbm [thread:$0]  (%p1103_p11), %s611_s9, 32, %s613_s21, %s598_s10  }
 0x141 PF: > { %s624_s29 = sand.u32 1, %s980_s12   ;;  %p1287_p7 = scmp.ge.s32.totalorder %s992_s15, 2 }
 0x142   : > { %s625_s11 = scalar_lea.sflag [#allocation4], %s624_s29 }
 0x143   : > { %p783_p9 = pnand %p1287_p7, %p1107_p12 }
 0x145   : > { %p784_p13 = pneg %p783_p9 }
 0x147   : > { %975 = dma.done.wait (%p784_p13), %s625_s11, 32  }
 0x148   : > { %977 = vsyncadd (%p784_p13), %s625_s11, 4294967264  ;;  %p17_p0 = scmp.ge.s32.totalorder %s1040_s16, 4   ;;  %s1288_s12 = smov %s984_s13 }
 0x149   : > { %s1289_s13 = smov %s988_s14  ;;  %s1290_s14 = smov %s1050_s19 }
 0x14a   : > { %s1291_s15 = smov %s1040_s16  ;;  %19 = sbr.rel (!%p17_p0) target bundleno = 6 (0x6), region = 94 }
 0x14f   :  { %631 = vsyncpa [#allocation3], 1 }
 0x150   :  { %633 = vsyncpa [#allocation3 + $0x1], 1 }
 0x151   :  { %634 = vsyncpa [#allocation6], 1 }
 0x152   :  { %636 = vsyncpa [#allocation6 + $0x1], 1 }
 0x153   :  { %637 = vsyncpa [#allocation4], 1 }
 0x154   :  { %639 = vsyncpa [#allocation4 + $0x1], 1 }

</bundles_post_ra>
